<compile_context>
chip_gen: v7x
topology: tpu7x:2x2x1
jax: 0.10.0
libtpu: 0.0.40
codegen_flags: <defaults>
</compile_context>

<pallas_src>
import jax
import jax.numpy as jnp
import numpy as np
from jax import lax
from jax.experimental import pallas as pl
from jax.experimental.pallas import tpu as pltpu

NTABLES = 3        # number of embedding tables in emb_list
NROWS = 64         # num_embeddings per table
EMB_DIM = 128      # embedding dim (lane-aligned)
DENSE_DIM = 256    # dense feature dim
B = 8              # batch size (= number of bags per table)
MAX_IDX = 128      # padded number of indices per table (lane-aligned)

TOTAL_DIM = DENSE_DIM + NTABLES * EMB_DIM


def _embbag_cat_dense_kernel(dense_ref, indices_ref, tables_ref, bounds_ref, out_ref):
    # dense_ref:   (B, DENSE_DIM)          f32
    # indices_ref: (NTABLES, 1, MAX_IDX)   i32
    # tables_ref:  (NTABLES, NROWS, EMB_DIM) f32
    # bounds_ref:  (2*NTABLES, B, 1)       i32   [0:NTABLES]=starts, [NTABLES:]=ends
    # out_ref:     (B, TOTAL_DIM)          f32
    j_iota = lax.broadcasted_iota(jnp.int32, (B, MAX_IDX), 1)         # (B, MAX_IDX)
    row_iota = lax.broadcasted_iota(jnp.int32, (NROWS, MAX_IDX), 0)   # (NROWS, MAX_IDX)

    # Dense features: lane-aligned unmasked slice store (no concatenate, no relayout).
    out_ref[:, 0:DENSE_DIM] = dense_ref[...]

    for t in range(NTABLES):                                          # static unroll, 3 tables
        starts = bounds_ref[t]               # (B, 1) i32
        ends = bounds_ref[NTABLES + t]       # (B, 1) i32
        idx_t = indices_ref[t]               # (1, MAX_IDX) i32

        # Segment membership S[b, j] = (starts[b] <= j < ends[b]) -- one VPU pass.
        seg = ((j_iota >= starts) & (j_iota < ends)).astype(jnp.bfloat16)     # (B, MAX_IDX)
        # One-hot (transposed) OT[r, j] = (indices[t, j] == r); 0/1 exact in bf16.
        onehot_t = (row_iota == idx_t).astype(jnp.bfloat16)                   # (NROWS, MAX_IDX)

        # counts[b, r] = #{ j : seg[b, j] and indices[t, j] == r }  (lane-dim contraction, MXU)
        counts = lax.dot_general(
            seg, onehot_t,
            dimension_numbers=(((1,), (1,)), ((), ())),
            preferred_element_type=jnp.float32)                               # (B, NROWS) exact

        # bags = counts @ table_t  -> (B, EMB_DIM)  (MXU, f32 table -> PyTorch-equal numerics)
        bags = jnp.dot(counts, tables_ref[t], preferred_element_type=jnp.float32)

        lo = DENSE_DIM + t * EMB_DIM                                          # 128-lane aligned
        out_ref[:, lo:lo + EMB_DIM] = bags.astype(out_ref.dtype)


def _make_bounds(offsets):
    # offsets: (..., NTABLES, B+1)  ->  bounds: (..., 2*NTABLES, B, 1)  (starts then ends)
    starts = offsets[..., :, :B]
    ends = offsets[..., :, 1:]
    return jnp.concatenate([starts, ends], axis=-2)[..., None]


def embedding_bag_list_cat_dense(indices3d, offsets, dense, tables):
    """Single forward pass: grid-less, everything a full VMEM block (~130 KiB)."""
    bounds = _make_bounds(offsets)                       # (2*NTABLES, B, 1) i32
    return pl.pallas_call(
        _embbag_cat_dense_kernel,
        out_shape=jax.ShapeDtypeStruct((B, TOTAL_DIM), jnp.float32),
    )(dense, indices3d, tables, bounds)


def embedding_bag_list_cat_dense_batched(indices4d, offsets, dense, tables):
    """Many independent forward passes fused behind one pallas_call.

    indices4d: (C, NTABLES, 1, MAX_IDX), offsets: (C, NTABLES, B+1),
    dense: (C, B, DENSE_DIM), tables: (NTABLES, NROWS, EMB_DIM) shared.
    Leading grid axis is "parallel": double-buffered input DMAs and, on v7x,
    sharded across both TensorCores.
    """
    num_calls = dense.shape[0]
    bounds = _make_bounds(offsets)                       # (C, 2*NTABLES, B, 1) i32
    return pl.pallas_call(
        _embbag_cat_dense_kernel,
        out_shape=jax.ShapeDtypeStruct((num_calls, B, TOTAL_DIM), jnp.float32),
        grid=(num_calls,),
        in_specs=[
            pl.BlockSpec((None, B, DENSE_DIM), lambda c: (c, 0, 0)),
            pl.BlockSpec((None, NTABLES, 1, MAX_IDX), lambda c: (c, 0, 0, 0)),
            pl.BlockSpec((NTABLES, NROWS, EMB_DIM), lambda c: (0, 0, 0)),   # shared tables
            pl.BlockSpec((None, 2 * NTABLES, B, 1), lambda c: (c, 0, 0, 0)),
        ],
        out_specs=pl.BlockSpec((None, B, TOTAL_DIM), lambda c: (c, 0, 0)),
        compiler_params=pltpu.CompilerParams(dimension_semantics=("parallel",)),
    )(dense, indices4d, tables, bounds)


def _reference(indices, offsets, dense, tables):
    parts = [dense]
    for t in range(NTABLES):
        rows = []
        for b in range(B):
            s, e = int(offsets[t, b]), int(offsets[t, b + 1])
            if e > s:
                rows.append(tables[t][indices[t, s:e]].sum(axis=0))
            else:
                rows.append(np.zeros((EMB_DIM,), np.float32))
        parts.append(np.stack(rows))
    return np.concatenate(parts, axis=1)


if __name__ == "__main__":
    key = jax.random.PRNGKey(0)
    k_tab, k_dense, k_sizes, k_idx = jax.random.split(key, 4)

    # Deterministic synthetic parameters / inputs.
    tables = jax.random.normal(k_tab, (NTABLES, NROWS, EMB_DIM), jnp.float32)
    dense = jax.random.normal(k_dense, (B, DENSE_DIM), jnp.float32)

    # Variable bag sizes in [1, 3]; include_last_offset=True style offsets.
    bag_sizes = jax.random.randint(k_sizes, (NTABLES, B), 1, 4).astype(jnp.int32)
    offsets = jnp.concatenate(
        [jnp.zeros((NTABLES, 1), jnp.int32),
         jnp.cumsum(bag_sizes, axis=1).astype(jnp.int32)], axis=1)      # (NTABLES, B+1)

    indices = jax.random.randint(k_idx, (NTABLES, MAX_IDX), 0, NROWS).astype(jnp.int32)
    indices3d = indices.reshape(NTABLES, 1, MAX_IDX)

    # --- single-call (grid-less) path ---
    out = jax.block_until_ready(
        embedding_bag_list_cat_dense(indices3d, offsets, dense, tables))
    ref = _reference(np.asarray(indices), np.asarray(offsets),
                     np.asarray(dense), np.asarray(tables))
    np.testing.assert_allclose(np.asarray(out), ref, rtol=1e-4, atol=1e-4)

    # --- batched (parallel grid) path: 4 independent forward passes in one call ---
    NCALLS = 4
    kb0, kb1, kb2 = jax.random.split(jax.random.PRNGKey(1), 3)
    dense_b = jax.random.normal(kb0, (NCALLS, B, DENSE_DIM), jnp.float32)
    sizes_b = jax.random.randint(kb1, (NCALLS, NTABLES, B), 1, 4).astype(jnp.int32)
    offsets_b = jnp.concatenate(
        [jnp.zeros((NCALLS, NTABLES, 1), jnp.int32),
         jnp.cumsum(sizes_b, axis=2).astype(jnp.int32)], axis=2)        # (C, NTABLES, B+1)
    indices_b = jax.random.randint(kb2, (NCALLS, NTABLES, MAX_IDX), 0, NROWS).astype(jnp.int32)

    out_b = jax.block_until_ready(
        embedding_bag_list_cat_dense_batched(
            indices_b.reshape(NCALLS, NTABLES, 1, MAX_IDX), offsets_b, dense_b, tables))
    for c in range(NCALLS):
        ref_c = _reference(np.asarray(indices_b[c]), np.asarray(offsets_b[c]),
                           np.asarray(dense_b[c]), np.asarray(tables))
        np.testing.assert_allclose(np.asarray(out_b[c]), ref_c, rtol=1e-4, atol=1e-4)

    print("KERNEL_OK")
</pallas_src>

<mosaic_0001>
module attributes {stable_mosaic.version = 11 : i64} {
  func.func @_embbag_cat_dense_kernel(%arg0: memref<8x256xf32, #tpu.memory_space<vmem>>, %arg1: memref<3x1x128xi32, #tpu.memory_space<vmem>>, %arg2: memref<3x64x128xf32, #tpu.memory_space<vmem>>, %arg3: memref<6x8x1xi32, #tpu.memory_space<vmem>>, %arg4: memref<8x640xf32, #tpu.memory_space<vmem>>) attributes {dimension_semantics = [], scalar_prefetch = 0 : i64, scratch_operands = 0 : i64, tpu.core_type = #tpu.core_type<tc>} {
    %0 = tpu.iota {dimensions = array<i32: 1>} : vector<8x128xi32>
    %1 = tpu.iota {dimensions = array<i32: 0>} : vector<64x128xi32>
    %c0 = arith.constant 0 : index
    %c0_0 = arith.constant 0 : index
    %2 = vector.load %arg0[%c0, %c0_0] : memref<8x256xf32, #tpu.memory_space<vmem>>, vector<8x256xf32>
    %c0_1 = arith.constant 0 : index
    %c0_2 = arith.constant 0 : index
    %3 = vector.load %arg4[%c0_1, %c0_2] : memref<8x640xf32, #tpu.memory_space<vmem>>, vector<8x256xf32>
    tpu.vector_store %arg4[%c0_1, %c0_2], %2 {strides = array<i32>} : memref<8x640xf32, #tpu.memory_space<vmem>>, vector<8x256xf32>,
    %c0_3 = arith.constant 0 : index
    %c0_4 = arith.constant 0 : index
    %c0_5 = arith.constant 0 : index
    %4 = vector.load %arg3[%c0_3, %c0_4, %c0_5] : memref<6x8x1xi32, #tpu.memory_space<vmem>>, vector<1x8x1xi32>
    %5 = vector.shape_cast %4 : vector<1x8x1xi32> to vector<8x1xi32>
    %c3 = arith.constant 3 : index
    %c0_6 = arith.constant 0 : index
    %c0_7 = arith.constant 0 : index
    %6 = vector.load %arg3[%c3, %c0_6, %c0_7] : memref<6x8x1xi32, #tpu.memory_space<vmem>>, vector<1x8x1xi32>
    %7 = vector.shape_cast %6 : vector<1x8x1xi32> to vector<8x1xi32>
    %c0_8 = arith.constant 0 : index
    %c0_9 = arith.constant 0 : index
    %c0_10 = arith.constant 0 : index
    %8 = vector.load %arg1[%c0_8, %c0_9, %c0_10] : memref<3x1x128xi32, #tpu.memory_space<vmem>>, vector<1x1x128xi32>
    %9 = vector.shape_cast %8 : vector<1x1x128xi32> to vector<1x128xi32>
    %10 = vector.broadcast %5 : vector<8x1xi32> to vector<8x128xi32>
    %11 = arith.cmpi sge, %0, %10 : vector<8x128xi32>
    %12 = vector.broadcast %7 : vector<8x1xi32> to vector<8x128xi32>
    %13 = arith.cmpi slt, %0, %12 : vector<8x128xi32>
    %14 = arith.andi %11, %13 : vector<8x128xi1>
    %15 = arith.extui %14 : vector<8x128xi1> to vector<8x128xi32>
    %16 = arith.sitofp %15 : vector<8x128xi32> to vector<8x128xf32>
    %17 = arith.truncf %16 : vector<8x128xf32> to vector<8x128xbf16>
    %18 = vector.broadcast %9 : vector<1x128xi32> to vector<64x128xi32>
    %19 = arith.cmpi eq, %1, %18 : vector<64x128xi32>
    %20 = arith.extui %19 : vector<64x128xi1> to vector<64x128xi32>
    %21 = arith.sitofp %20 : vector<64x128xi32> to vector<64x128xf32>
    %22 = arith.truncf %21 : vector<64x128xf32> to vector<64x128xbf16>
    %cst = arith.constant dense<0.000000e+00> : vector<8x64xf32>
    %23 = tpu.matmul %17, %22, %cst {dimension_numbers = #tpu.dot_dimension_numbers<[1], [1], [0], [0], [0, 0, 1, 0], [], []>} : vector<8x128xbf16>, vector<64x128xbf16>, vector<8x64xf32> -> vector<8x64xf32>
    %c0_11 = arith.constant 0 : index
    %c0_12 = arith.constant 0 : index
    %c0_13 = arith.constant 0 : index
    %24 = vector.load %arg2[%c0_11, %c0_12, %c0_13] : memref<3x64x128xf32, #tpu.memory_space<vmem>>, vector<1x64x128xf32>
    %25 = vector.shape_cast %24 : vector<1x64x128xf32> to vector<64x128xf32>
    %cst_14 = arith.constant dense<0.000000e+00> : vector<8x128xf32>
    %26 = tpu.matmul %23, %25, %cst_14 {dimension_numbers = #tpu.dot_dimension_numbers<[1], [0], [0], [1], [0, 0, 1, 1], [], []>} : vector<8x64xf32>, vector<64x128xf32>, vector<8x128xf32> -> vector<8x128xf32>
    %c0_15 = arith.constant 0 : index
    %c256 = arith.constant 256 : index
    %27 = vector.load %arg4[%c0_15, %c256] : memref<8x640xf32, #tpu.memory_space<vmem>>, vector<8x128xf32>
    tpu.vector_store %arg4[%c0_15, %c256], %26 {strides = array<i32>} : memref<8x640xf32, #tpu.memory_space<vmem>>, vector<8x128xf32>,
    %c1 = arith.constant 1 : index
    %c0_16 = arith.constant 0 : index
    %c0_17 = arith.constant 0 : index
    %28 = vector.load %arg3[%c1, %c0_16, %c0_17] : memref<6x8x1xi32, #tpu.memory_space<vmem>>, vector<1x8x1xi32>
    %29 = vector.shape_cast %28 : vector<1x8x1xi32> to vector<8x1xi32>
    %c4 = arith.constant 4 : index
    %c0_18 = arith.constant 0 : index
    %c0_19 = arith.constant 0 : index
    %30 = vector.load %arg3[%c4, %c0_18, %c0_19] : memref<6x8x1xi32, #tpu.memory_space<vmem>>, vector<1x8x1xi32>
    %31 = vector.shape_cast %30 : vector<1x8x1xi32> to vector<8x1xi32>
    %c1_20 = arith.constant 1 : index
    %c0_21 = arith.constant 0 : index
    %c0_22 = arith.constant 0 : index
    %32 = vector.load %arg1[%c1_20, %c0_21, %c0_22] : memref<3x1x128xi32, #tpu.memory_space<vmem>>, vector<1x1x128xi32>
    %33 = vector.shape_cast %32 : vector<1x1x128xi32> to vector<1x128xi32>
    %34 = vector.broadcast %29 : vector<8x1xi32> to vector<8x128xi32>
    %35 = arith.cmpi sge, %0, %34 : vector<8x128xi32>
    %36 = vector.broadcast %31 : vector<8x1xi32> to vector<8x128xi32>
    %37 = arith.cmpi slt, %0, %36 : vector<8x128xi32>
    %38 = arith.andi %35, %37 : vector<8x128xi1>
    %39 = arith.extui %38 : vector<8x128xi1> to vector<8x128xi32>
    %40 = arith.sitofp %39 : vector<8x128xi32> to vector<8x128xf32>
    %41 = arith.truncf %40 : vector<8x128xf32> to vector<8x128xbf16>
    %42 = vector.broadcast %33 : vector<1x128xi32> to vector<64x128xi32>
    %43 = arith.cmpi eq, %1, %42 : vector<64x128xi32>
    %44 = arith.extui %43 : vector<64x128xi1> to vector<64x128xi32>
    %45 = arith.sitofp %44 : vector<64x128xi32> to vector<64x128xf32>
    %46 = arith.truncf %45 : vector<64x128xf32> to vector<64x128xbf16>
    %cst_23 = arith.constant dense<0.000000e+00> : vector<8x64xf32>
    %47 = tpu.matmul %41, %46, %cst_23 {dimension_numbers = #tpu.dot_dimension_numbers<[1], [1], [0], [0], [0, 0, 1, 0], [], []>} : vector<8x128xbf16>, vector<64x128xbf16>, vector<8x64xf32> -> vector<8x64xf32>
    %c1_24 = arith.constant 1 : index
    %c0_25 = arith.constant 0 : index
    %c0_26 = arith.constant 0 : index
    %48 = vector.load %arg2[%c1_24, %c0_25, %c0_26] : memref<3x64x128xf32, #tpu.memory_space<vmem>>, vector<1x64x128xf32>
    %49 = vector.shape_cast %48 : vector<1x64x128xf32> to vector<64x128xf32>
    %cst_27 = arith.constant dense<0.000000e+00> : vector<8x128xf32>
    %50 = tpu.matmul %47, %49, %cst_27 {dimension_numbers = #tpu.dot_dimension_numbers<[1], [0], [0], [1], [0, 0, 1, 1], [], []>} : vector<8x64xf32>, vector<64x128xf32>, vector<8x128xf32> -> vector<8x128xf32>
    %c0_28 = arith.constant 0 : index
    %c384 = arith.constant 384 : index
    %51 = vector.load %arg4[%c0_28, %c384] : memref<8x640xf32, #tpu.memory_space<vmem>>, vector<8x128xf32>
    tpu.vector_store %arg4[%c0_28, %c384], %50 {strides = array<i32>} : memref<8x640xf32, #tpu.memory_space<vmem>>, vector<8x128xf32>,
    %c2 = arith.constant 2 : index
    %c0_29 = arith.constant 0 : index
    %c0_30 = arith.constant 0 : index
    %52 = vector.load %arg3[%c2, %c0_29, %c0_30] : memref<6x8x1xi32, #tpu.memory_space<vmem>>, vector<1x8x1xi32>
    %53 = vector.shape_cast %52 : vector<1x8x1xi32> to vector<8x1xi32>
    %c5 = arith.constant 5 : index
    %c0_31 = arith.constant 0 : index
    %c0_32 = arith.constant 0 : index
    %54 = vector.load %arg3[%c5, %c0_31, %c0_32] : memref<6x8x1xi32, #tpu.memory_space<vmem>>, vector<1x8x1xi32>
    %55 = vector.shape_cast %54 : vector<1x8x1xi32> to vector<8x1xi32>
    %c2_33 = arith.constant 2 : index
    %c0_34 = arith.constant 0 : index
    %c0_35 = arith.constant 0 : index
    %56 = vector.load %arg1[%c2_33, %c0_34, %c0_35] : memref<3x1x128xi32, #tpu.memory_space<vmem>>, vector<1x1x128xi32>
    %57 = vector.shape_cast %56 : vector<1x1x128xi32> to vector<1x128xi32>
    %58 = vector.broadcast %53 : vector<8x1xi32> to vector<8x128xi32>
    %59 = arith.cmpi sge, %0, %58 : vector<8x128xi32>
    %60 = vector.broadcast %55 : vector<8x1xi32> to vector<8x128xi32>
    %61 = arith.cmpi slt, %0, %60 : vector<8x128xi32>
    %62 = arith.andi %59, %61 : vector<8x128xi1>
    %63 = arith.extui %62 : vector<8x128xi1> to vector<8x128xi32>
    %64 = arith.sitofp %63 : vector<8x128xi32> to vector<8x128xf32>
    %65 = arith.truncf %64 : vector<8x128xf32> to vector<8x128xbf16>
    %66 = vector.broadcast %57 : vector<1x128xi32> to vector<64x128xi32>
    %67 = arith.cmpi eq, %1, %66 : vector<64x128xi32>
    %68 = arith.extui %67 : vector<64x128xi1> to vector<64x128xi32>
    %69 = arith.sitofp %68 : vector<64x128xi32> to vector<64x128xf32>
    %70 = arith.truncf %69 : vector<64x128xf32> to vector<64x128xbf16>
    %cst_36 = arith.constant dense<0.000000e+00> : vector<8x64xf32>
    %71 = tpu.matmul %65, %70, %cst_36 {dimension_numbers = #tpu.dot_dimension_numbers<[1], [1], [0], [0], [0, 0, 1, 0], [], []>} : vector<8x128xbf16>, vector<64x128xbf16>, vector<8x64xf32> -> vector<8x64xf32>
    %c2_37 = arith.constant 2 : index
    %c0_38 = arith.constant 0 : index
    %c0_39 = arith.constant 0 : index
    %72 = vector.load %arg2[%c2_37, %c0_38, %c0_39] : memref<3x64x128xf32, #tpu.memory_space<vmem>>, vector<1x64x128xf32>
    %73 = vector.shape_cast %72 : vector<1x64x128xf32> to vector<64x128xf32>
    %cst_40 = arith.constant dense<0.000000e+00> : vector<8x128xf32>
    %74 = tpu.matmul %71, %73, %cst_40 {dimension_numbers = #tpu.dot_dimension_numbers<[1], [0], [0], [1], [0, 0, 1, 1], [], []>} : vector<8x64xf32>, vector<64x128xf32>, vector<8x128xf32> -> vector<8x128xf32>
    %c0_41 = arith.constant 0 : index
    %c512 = arith.constant 512 : index
    %75 = vector.load %arg4[%c0_41, %c512] : memref<8x640xf32, #tpu.memory_space<vmem>>, vector<8x128xf32>
    tpu.vector_store %arg4[%c0_41, %c512], %74 {strides = array<i32>} : memref<8x640xf32, #tpu.memory_space<vmem>>, vector<8x128xf32>,
    return
  }
}

</mosaic_0001>

<bundles_post_ra>
// kernel: tpu_custom_call.1
= control target key start
LH: loop header
LB: loop body
LE: loop exit
PB: predicated region body
PF: predicated region fallthrough
CT: control target
= control target key end

     0   :  { %9 = vsyncpa [#allocation3], 0  ;;  %s1081_s0 = inlined_call_operand.vmem [shape: f32[8,256], index: 0, kind: input, shape index: {}]   ;;  %s1082_s1 = inlined_call_operand.vmem [shape: s32[3,1,128], index: 1, kind: input, shape index: {}]   ;;  %s1083_s2 = inlined_call_operand.hbm [shape: f32[3,64,128], index: 2, kind: input, shape index: {}]   ;;  %s1084_s3 = inlined_call_operand.vmem [shape: s32[6,8,1], index: 3, kind: input, shape index: {}]   ;;  %s1085_s4 = inlined_call_operand.hbm [shape: f32[8,640], index: 4, kind: output, shape index: {}]  }
   0x1   :  { %10 = vsyncpa [#allocation4], 0  ;;  %s880_s15 = smov [#allocation2]   ;;  %s832_s19 = scalar_lea.hbm %s1083_s2, 3072 }
   0x2   :  { %s20_s16 = sshll.u32 %s880_s15, 4  ;;  %p833_p0 = scmp.ne.s32.totalorder %s1083_s2, %s832_s19  ;;  %s21_s16 = int_to_ptr.vmem [resolvable:$true] %s20_s16 }
   0x3   :  { %p836_p1 = scmp.lt.u32.totalorder %s832_s19, %s1083_s2 }
   0x5   :  { %p838_p2 = pnand %p836_p1, %p833_p0 }
   0x7   :  { %841 = shalt.err (!%p838_p2)
}
   0x8   :  { %s842_s24 = scalar_lea.vmem %s21_s16, 3072  ;;  %p847_p4 = scmp.lt.s32.totalorder %s21_s16, %s21_s16 }
   0x9   :  { %p843_p3 = scmp.ne.s32.totalorder %s21_s16, %s842_s24  ;;  %p848_p5 = scmp.lt.s32.totalorder %s842_s24, %s842_s24 }
   0xb   :  { %p849_p6 = por %p848_p5, %p847_p4 }
   0xd   :  { %p850_p7 = pnand %p849_p6, %p843_p3 }
   0xf   :  { %853 = shalt.err (!%p850_p7)
}
  0x10   :  { %s881_s25 = smov 128   ;;  %s882_s26 = smov 8  }
  0x11   :  { %26 = dma.hbm_to_vmem [thread:$0]  %s1083_s2, 3072, %s21_s16, [#allocation3], %s881_s25, %s881_s25, %s882_s26  }
  0x12   :  { %876 = dma.done.wait [#allocation3], 3072  }
  0x13   :  { %877 = vsyncadd [#allocation3], 4294964224  ;;  %v33_v0 = vlaneseq  ;;  %v883_v1 = vmov 0   ;;  %v884_v2 = vmov 0.0   ;;  %v602_v5 = vld [vmem:[%s1084_s3 + $0x8] sm:$0xff]  ;;  %v48_v6 = vld [vmem:[%s1084_s3] sm:$0xff] }
  0x14   :  { %831 = vset.pattern.permute.xlu1 %v883_v1  ;;  %830 = vset.pattern.permute.xlu0 %v883_v1  ;;  %v603_v7 = vld [vmem:[%s1084_s3 + $0x20] sm:$0xff]  ;;  %v580_v8 = vld [vmem:[%s1084_s3 + $0x18] sm:$0xff]  ;;  %v627_v12 = vld [vmem:[%s1084_s3 + $0x28] sm:$0xff]  ;;  %v885_v14 = vmov 1.0|1.0   ;;  %vm886_vm5 = vmmov 0  }
  0x15   :  { %692 = vmatprep.subr.bf16.mxu0 %v884_v2  ;;  %v928_v3 = vshrl.u32 %v33_v0, 7  ;;  %226 = vperm.xlu1 %831, %v602_v5   ;;  %v582_v9 = vld [vmem:[%s1082_s1] ss:$0 sm:$0xff]  ;;  %v626_v13 = vld [vmem:[%s1084_s3 + $0x10] sm:$0xff]  ;;  %v137_v20 = vld [vmem:[#allocation2 + $0x8] sm:$0xff]  ;;  %v887_v22 = vmov 0.0|0.0  }
  0x16   :  { %53 = vperm.xlu0 %830, %v48_v6   ;;  %700 = vmatprep.mubr.msk.bf16.mxu0 %vm886_vm5, %v884_v2  ;;  %v136_v19 = vld [vmem:[#allocation2] sm:$0xff]  ;;  %v138_v21 = vld [vmem:[#allocation2 + $0x10] sm:$0xff]  ;;  %v139_v24 = vld [vmem:[#allocation2 + $0x18] sm:$0xff]  ;;  %v34_v32 = vand.u32 127, %v33_v0  ;;  %s888_s22 = smov [#allocation5]  }
  0x17   :  { %v931_v4 = vadd.s32 8, %v928_v3  ;;  %vm68_vm0 = vcmp.eq.s32.totalorder %v928_v3, %v582_v9  ;;  %v951_v10 = vadd.s32 16, %v928_v3  ;;  %v954_v11 = vadd.s32 24, %v928_v3  ;;  %720 = vmatprep.mubr.msk.f32.mxu1 %vm886_vm5, %v884_v2  ;;  %785 = vmatprep.subr.bf16.mxu1 %v887_v22  ;;  %v140_v26 = vld [vmem:[#allocation2 + $0x20] sm:$0xff]  ;;  %v141_v27 = vld [vmem:[#allocation2 + $0x28] sm:$0xff]  ;;  %v142_v29 = vld [vmem:[#allocation2 + $0x30] sm:$0xff] }
  0x18   :  { %v971_v15 = vadd.s32 32, %v928_v3  ;;  %v974_v16 = vadd.s32 40, %v928_v3  ;;  %v981_v17 = vadd.s32 48, %v928_v3  ;;  %v984_v18 = vadd.s32 56, %v928_v3  ;;  %v143_v30 = vld [vmem:[#allocation2 + $0x38] sm:$0xff]  ;;  %v310_v50 = vld [vmem:[#allocation2 + $0x40] sm:$0xff] }
  0x19   :  { %vm69_vm1 = vcmp.eq.s32.totalorder %v931_v4, %v582_v9  ;;  %230 = vperm.xlu1 %831, %v603_v7   ;;  %vm70_vm3 = vcmp.eq.s32.totalorder %v951_v10, %v582_v9  ;;  %vm71_vm4 = vcmp.eq.s32.totalorder %v954_v11, %v582_v9  ;;  %v786_v23 = vpack.c.bf16 %v137_v20, %v136_v19  ;;  %v630_v35 = vld [vmem:[%s1082_s1 + $0x2] ss:$0 sm:$0xff]  ;;  %v606_v41 = vld [vmem:[%s1082_s1 + $0x1] ss:$0 sm:$0xff]  ;;  %v311_v51 = vld [vmem:[#allocation2 + $0x48] sm:$0xff]  ;;  %s571_s23 = sshll.u32 %s888_s22, 4  ;;  %s572_s23 = int_to_ptr.vmem [resolvable:$true] %s571_s23 }
  0x1a   :  { %vm591_vm2 = vmpackc.low %vm69_vm1, %vm68_vm0  ;;  %57 = vperm.xlu0 %830, %v580_v8   ;;  %vm72_vm7 = vcmp.eq.s32.totalorder %v971_v15, %v582_v9  ;;  %vm73_vm8 = vcmp.eq.s32.totalorder %v974_v16, %v582_v9  ;;  %vm74_vm10 = vcmp.eq.s32.totalorder %v981_v17, %v582_v9  ;;  %vm75_vm11 = vcmp.eq.s32.totalorder %v984_v18, %v582_v9  ;;  %v312_v52 = vld [vmem:[#allocation2 + $0x50] sm:$0xff]  ;;  %v313_v54 = vld [vmem:[#allocation2 + $0x58] sm:$0xff]  ;;  %s854_s24 = scalar_lea.vmem %s572_s23, 640  ;;  %p859_p9 = scmp.lt.s32.totalorder %s572_s23, %s572_s23 }
  0x1b   :  { %693 = vmatpush3.bf16.xpose.msk.msra.mxu0 %vm591_vm2, %v885_v14  ;;  %vm593_vm6 = vmpackc.low %vm71_vm4, %vm70_vm3  ;;  %787 = vmatpush3.bf16.msra.mxu1 %v786_v23  ;;  %v789_v25 = vpack.c.bf16 %v139_v24, %v138_v21  ;;  %v792_v28 = vpack.c.bf16 %v141_v27, %v140_v26  ;;  %v795_v31 = vpack.c.bf16 %v143_v30, %v142_v29  ;;  %v314_v56 = vld [vmem:[#allocation2 + $0x60] sm:$0xff]  ;;  %v315_v57 = vld [vmem:[#allocation2 + $0x68] sm:$0xff]  ;;  %p855_p8 = scmp.ne.s32.totalorder %s572_s23, %s854_s24  ;;  %p860_p10 = scmp.lt.s32.totalorder %s854_s24, %s854_s24 }
  0x1c   :  { %694 = vmatprep.subr.bf16.mxu0 %v884_v2  ;;  %vm595_vm9 = vmpackc.low %vm73_vm8, %vm72_vm7  ;;  %788 = vmatprep.subr.bf16.mxu1 %v887_v22  ;;  %vm414_vm14 = vcmp.eq.s32.totalorder %v928_v3, %v630_v35  ;;  %vm415_vm15 = vcmp.eq.s32.totalorder %v931_v4, %v630_v35  ;;  %vm416_vm8 = vcmp.eq.s32.totalorder %v951_v10, %v630_v35  ;;  %v316_v59 = vld [vmem:[#allocation2 + $0x70] sm:$0xff]  ;;  %v317_v60 = vld [vmem:[#allocation2 + $0x78] sm:$0xff] }
  0x1d   :  { %403 = vperm.xlu1 %831, %v627_v12   ;;  %vm597_vm12 = vmpackc.low %vm75_vm11, %vm74_vm10  ;;  %vm418_vm11 = vcmp.eq.s32.totalorder %v971_v15, %v630_v35  ;;  %v798_v53 = vpack.c.bf16 %v311_v51, %v310_v50  ;;  %v801_v55 = vpack.c.bf16 %v313_v54, %v312_v52  ;;  %v804_v58 = vpack.c.bf16 %v315_v57, %v314_v56  ;;  %v483_v0 = vld [vmem:[#allocation2 + $0x80] sm:$0xff]  ;;  %v484_v1 = vld [vmem:[#allocation2 + $0x88] sm:$0xff]  ;;  %p861_p11 = por %p860_p10, %p859_p9 }
  0x1e   :  { %399 = vperm.xlu0 %830, %v626_v13   ;;  %vm639_vm4 = vmpackc.low %vm415_vm15, %vm414_vm14  ;;  %vm420_vm14 = vcmp.eq.s32.totalorder %v981_v17, %v630_v35  ;;  %vm421_vm15 = vcmp.eq.s32.totalorder %v984_v18, %v630_v35  ;;  %v807_v61 = vpack.c.bf16 %v317_v60, %v316_v59  ;;  %v486_v5 = vld [vmem:[#allocation2 + $0x98] sm:$0xff]  ;;  %v488_v12 = vld [vmem:[#allocation2 + $0xa8] sm:$0xff] }
  0x1f   :  { %790 = vmatpush3.bf16.msra.mxu1 %v789_v25  ;;  %p862_p12 = pnand %p861_p11, %p855_p8 }
  0x20   :  { %791 = vmatprep.subr.bf16.mxu1 %v887_v22 }
  0x23   :  { %695 = vmatpush3.bf16.xpose.msk.msra.mxu0 %vm593_vm6, %v885_v14  ;;  %793 = vmatpush3.bf16.msra.mxu1 %v792_v28 }
  0x24   :  { %696 = vmatprep.subr.bf16.mxu0 %v884_v2  ;;  %794 = vmatprep.subr.bf16.mxu1 %v887_v22 }
  0x27   :  { %796 = vmatpush3.bf16.msra.mxu1 %v795_v31 }
  0x28   :  { %723 = vmatprep.subr.bf16.mxu1 %v884_v2 }
  0x2b   :  { %697 = vmatpush3.bf16.xpose.msk.msra.mxu0 %vm595_vm9, %v885_v14  ;;  %vm417_vm9 = vcmp.eq.s32.totalorder %v954_v11, %v630_v35 }
  0x2c   :  { %698 = vmatprep.subr.bf16.mxu0 %v884_v2  ;;  %vm641_vm10 = vmpackc.low %vm417_vm9, %vm416_vm8  ;;  %vm242_vm8 = vcmp.eq.s32.totalorder %v931_v4, %v606_v41  ;;  %vm144_vm9 = vcmask 523264   ;;  %v485_v4 = vld [vmem:[#allocation2 + $0x90] sm:$0xff] }
  0x2d   :  { %v813_v9 = vpack.c.bf16 %v486_v5, %v485_v4 }
  0x33   :  { %699 = vmatpush3.bf16.xpose.msk.msra.mxu0 %vm597_vm12, %v885_v14  ;;  %vm419_vm12 = vcmp.eq.s32.totalorder %v974_v16, %v630_v35 }
  0x34   :  { %754 = vmatprep.subr.bf16.mxu0 %v884_v2 }
  0x94   :  { %v227_v33 = vpop.permute.xlu1 %226 }
  0x95   :  { %v54_v34 = vpop.permute.xlu0 %53  ;;  %vm228_vm13 = vcmp.ge.s32.totalorder %v34_v32, %v227_v33 }
  0x96   :  { %vm55_vm3 = vcmp.ge.s32.totalorder %v34_v32, %v54_v34 }
  0x98   :  { %v231_v36 = vpop.permute.xlu1 %230 }
  0x99   :  { %v58_v37 = vpop.permute.xlu0 %57  ;;  %vm232_vm0 = vcmp.lt.s32.totalorder %v34_v32, %v231_v36 }
  0x9a   :  { %vm59_vm1 = vcmp.lt.s32.totalorder %v34_v32, %v58_v37  ;;  %vm1003_vm2 = vmand %vm228_vm13, %vm232_vm0 }
  0x9b   :  { %vm60_vm6 = vmand %vm55_vm3, %vm59_vm1 }
  0x9c   :  { %vm599_vm7 = vmpackc.low %vm60_vm6, %vm60_vm6  ;;  %v404_v39 = vpop.permute.xlu1 %403 }
  0x9d   :  { %701 = vmatmul.mubr.msk.bf16.vlgmr.msra.gmra.mrb[0].mxu0 %vm599_vm7, %v885_v14  ;;  %vm643_vm13 = vmpackc.low %vm419_vm12, %vm418_vm11  ;;  %v400_v40 = vpop.permute.xlu0 %399  ;;  %vm405_vm1 = vcmp.lt.s32.totalorder %v34_v32, %v404_v39  ;;  %vm241_vm7 = vcmp.eq.s32.totalorder %v928_v3, %v606_v41  ;;  %vm243_vm11 = vcmp.eq.s32.totalorder %v951_v10, %v606_v41  ;;  %vm244_vm12 = vcmp.eq.s32.totalorder %v954_v11, %v606_v41  ;;  %v487_v11 = vld [vmem:[#allocation2 + $0xa0] sm:$0xff] }
  0x9e   :  { %755 = vmatpush3.bf16.xpose.msk.msra.mxu0 %vm639_vm4, %v885_v14  ;;  %762 = vmatprep.mubr.msk.bf16.mxu0 %vm886_vm5, %v884_v2  ;;  %vm645_vm0 = vmpackc.low %vm421_vm15, %vm420_vm14  ;;  %vm401_vm3 = vcmp.ge.s32.totalorder %v34_v32, %v400_v40  ;;  %vm245_vm14 = vcmp.eq.s32.totalorder %v971_v15, %v606_v41  ;;  %vm246_vm15 = vcmp.eq.s32.totalorder %v974_v16, %v606_v41  ;;  %v490_v15 = vld [vmem:[#allocation2 + $0xb8] sm:$0xff] }
  0x9f   :  { %756 = vmatprep.subr.bf16.mxu0 %v884_v2  ;;  %vm406_vm4 = vmand %vm401_vm3, %vm405_vm1  ;;  %vm247_vm1 = vcmp.eq.s32.totalorder %v981_v17, %v606_v41  ;;  %vm248_vm3 = vcmp.eq.s32.totalorder %v984_v18, %v606_v41  ;;  %v810_v3 = vpack.c.bf16 %v484_v1, %v483_v0  ;;  %v816_v13 = vpack.c.bf16 %v488_v12, %v487_v11  ;;  %v45_v17 = vld [vmem:[%s1081_s0 + $0x8] sm:$0xff] }
  0xa0   :  { %vm647_vm6 = vmpackc.low %vm406_vm4, %vm406_vm4  ;;  %47 = vst [vmem:[#allocation5 + $0x8] sm:$0xff] %v45_v17 }
  0xa1   :  { %vm621_vm4 = vmpackc.low %vm248_vm3, %vm247_vm1 }
  0xa6   :  { %757 = vmatpush3.bf16.xpose.msk.msra.mxu0 %vm641_vm10, %v885_v14  ;;  %vm615_vm10 = vmpackc.low %vm242_vm8, %vm241_vm7 }
  0xa7   :  { %758 = vmatprep.subr.bf16.mxu0 %v884_v2 }
  0xae   :  { %759 = vmatpush3.bf16.xpose.msk.msra.mxu0 %vm643_vm13, %v885_v14  ;;  %vm617_vm13 = vmpackc.low %vm244_vm12, %vm243_vm11 }
  0xaf   :  { %760 = vmatprep.subr.bf16.mxu0 %v884_v2 }
  0xb6   :  { %761 = vmatpush3.bf16.xpose.msk.msra.mxu0 %vm645_vm0, %v885_v14  ;;  %vm619_vm0 = vmpackc.low %vm246_vm15, %vm245_vm14 }
  0xbd   :  { %763 = vmatmul.mubr.msk.bf16.vlgmr.msra.gmra.mrb[4].mxu0 %vm647_vm6, %v885_v14  ;;  %vm623_vm6 = vmpackc.low %vm1003_vm2, %vm1003_vm2 }
 0x170   :  { %v130_v42 = vpop.f32.mrb[0].mxu0 }
 0x171   :  { %v702_v43 = vpop.f32.mrb[1].mxu0  ;;  %721 = vmatmul.mubr.msk.f32.vlgmr.msra.gmra.mrb[0].mxu1 %vm144_vm9, %v130_v42 }
 0x172   :  { %724 = vmatpush3.bf16.xpose.msk.msra.mxu1 %vm615_vm10, %v885_v14  ;;  %v133_v44 = vpop.f32.mrb[2].mxu0  ;;  %731 = vmatprep.mubr.msk.bf16.mxu1 %vm886_vm5, %v884_v2 }
 0x173   :  { %v703_v45 = vpop.f32.mrb[3].mxu0  ;;  %725 = vmatprep.subr.bf16.mxu1 %v884_v2 }
 0x17a   :  { %726 = vmatpush3.bf16.xpose.msk.msra.mxu1 %vm617_vm13, %v885_v14 }
 0x17b   :  { %727 = vmatprep.subr.bf16.mxu1 %v884_v2 }
 0x182   :  { %728 = vmatpush3.bf16.xpose.msk.msra.mxu1 %vm619_vm0, %v885_v14 }
 0x183   :  { %729 = vmatprep.subr.bf16.mxu1 %v884_v2 }
 0x18a   :  { %730 = vmatpush3.bf16.xpose.msk.msra.mxu1 %vm621_vm4, %v885_v14 }
 0x18b   :  { %797 = vmatprep.subr.bf16.mxu1 %v887_v22 }
 0x190   :  { %v476_v46 = vpop.f32.mrb[4].mxu0 }
 0x191   :  { %732 = vmatmul.mubr.msk.bf16.vlgmr.msra.gmra.mrb[4].mxu1 %vm623_vm6, %v885_v14  ;;  %v764_v47 = vpop.f32.mrb[5].mxu0  ;;  %v489_v14 = vld [vmem:[#allocation2 + $0xb0] sm:$0xff] }
 0x192   :  { %v479_v48 = vpop.f32.mrb[6].mxu0  ;;  %751 = vmatprep.mubr.msk.f32.mxu1 %vm886_vm5, %v884_v2  ;;  %799 = vmatpush3.bf16.msra.mxu1 %v798_v53  ;;  %v819_v16 = vpack.c.bf16 %v490_v15, %v489_v14 }
 0x193   :  { %v765_v49 = vpop.f32.mrb[7].mxu0  ;;  %800 = vmatprep.subr.bf16.mxu1 %v887_v22 }
 0x196   :  { %802 = vmatpush3.bf16.msra.mxu1 %v801_v55 }
 0x197   :  { %803 = vmatprep.subr.bf16.mxu1 %v887_v22 }
 0x19a   :  { %805 = vmatpush3.bf16.msra.mxu1 %v804_v58 }
 0x19b   :  { %806 = vmatprep.subr.bf16.mxu1 %v887_v22 }
 0x19e   :  { %808 = vmatpush3.bf16.msra.mxu1 %v807_v61 }
 0x19f   :  { %809 = vmatprep.subr.bf16.mxu1 %v887_v22 }
 0x244   :  { %v214_v62 = vpop.f32.mrb[0].mxu1 }
 0x245   :  { %218 = vst [vmem:[#allocation5 + $0x10] sm:$0xff] %v214_v62  ;;  %v722_v63 = vpop.f32.mrb[1].mxu1 }
 0x264   :  { %v303_v6 = vpop.f32.mrb[4].mxu1 }
 0x265   :  { %v733_v7 = vpop.f32.mrb[5].mxu1  ;;  %752 = vmatmul.mubr.msk.f32.vlgmr.msra.gmra.mrb[2].mxu1 %vm144_vm9, %v303_v6 }
 0x266   :  { %811 = vmatpush3.bf16.msra.mxu1 %v810_v3  ;;  %v306_v8 = vpop.f32.mrb[6].mxu1  ;;  %782 = vmatprep.mubr.msk.f32.mxu1 %vm886_vm5, %v884_v2  ;;  %v44_v2 = vld [vmem:[%s1081_s0] sm:$0xff] }
 0x267   :  { %v734_v10 = vpop.f32.mrb[7].mxu1  ;;  %812 = vmatprep.subr.bf16.mxu1 %v887_v22  ;;  %46 = vst [vmem:[#allocation5] sm:$0xff] %v44_v2 }
 0x26a   :  { %814 = vmatpush3.bf16.msra.mxu1 %v813_v9 }
 0x26b   :  { %815 = vmatprep.subr.bf16.mxu1 %v887_v22 }
 0x26e   :  { %817 = vmatpush3.bf16.msra.mxu1 %v816_v13 }
 0x26f   :  { %818 = vmatprep.subr.bf16.mxu1 %v887_v22 }
 0x272   :  { %820 = vmatpush3.bf16.msra.mxu1 %v819_v16 }
 0x275   :  { %783 = vmatmul.mubr.msk.f32.vlgmr.msra.gmra.mrb[8].mxu1 %vm144_vm9, %v476_v46 }
 0x338   :  { %v387_v18 = vpop.f32.mrb[2].mxu1 }
 0x339   :  { %391 = vst [vmem:[#allocation5 + $0x18] sm:$0xff] %v387_v18  ;;  %v753_v19 = vpop.f32.mrb[3].mxu1 }
 0x348   :  { %v560_v20 = vpop.f32.mrb[8].mxu1 }
 0x349   :  { %564 = vst [vmem:[#allocation5 + $0x20] sm:$0xff] %v560_v20  ;;  %v784_v21 = vpop.f32.mrb[9].mxu1 }
 0x34a   :  { %865 = shalt.err (!%p862_p12)
}
 0x34b   :  { %s866_s26 = scalar_lea.hbm %s1085_s4, 640 }
 0x34c   :  { %p867_p13 = scmp.ne.s32.totalorder %s1085_s4, %s866_s26  ;;  %p870_p0 = scmp.lt.u32.totalorder %s866_s26, %s1085_s4 }
 0x34e   :  { %p872_p1 = pnand %p870_p0, %p867_p13 }
 0x350   :  { %875 = shalt.err (!%p872_p1)
}
 0x351   :  { %574 = dma.vmem_to_hbm [thread:$0]  %s572_s23, 640, %s1085_s4, [#allocation4]  }
 0x352   :  { %878 = dma.done.wait [#allocation4], 640  }
 0x353   :  { %879 = vsyncadd [#allocation4], 4294966656 }
 0x354   :  { %578 = vsyncpa [#allocation3], 1 }
 0x355   :  { %579 = vsyncpa [#allocation4], 1 }

</bundles_post_ra>
